<compile_context>
chip_gen: v5e
topology: v5e:2x2
jax: 0.10.0
libtpu: 0.0.40
codegen_flags: <defaults>
</compile_context>

<pallas_src>
import functools

import jax
import jax.numpy as jnp
from jax import lax
from jax.experimental import pallas as pl
from jax.experimental.pallas import tpu as pltpu


# --------------------------------------------------------------------------------
# Kernels
# --------------------------------------------------------------------------------
def _embed_kernel(x_ref, w_ref, pb_ref, o_ref):
    """Full-K path.  x_ref: (1, TP, K), w_ref: (K, N), pb_ref: (TP, N), o_ref: (1, TP, N)."""
    y = jnp.dot(x_ref[0], w_ref[...], preferred_element_type=jnp.float32)
    o_ref[0] = (y + pb_ref[...].astype(jnp.float32)).astype(o_ref.dtype)


def _embed_kernel_splitk(x_ref, w_ref, pb_ref, o_ref, acc_ref):
    """Split-K path.  Reduction axis (k) is the innermost grid axis; acc_ref is f32."""
    k = pl.program_id(2)

    @pl.when(k == 0)
    def _():
        acc_ref[...] = jnp.zeros_like(acc_ref)

    acc_ref[...] += jnp.dot(x_ref[0], w_ref[...], preferred_element_type=jnp.float32)

    @pl.when(k == pl.num_programs(2) - 1)
    def _():
        o_ref[0] = (acc_ref[...] + pb_ref[...].astype(jnp.float32)).astype(o_ref.dtype)


# --------------------------------------------------------------------------------
# Tiling heuristics
# --------------------------------------------------------------------------------
def _choose_k_tile(K, max_k_tile):
    """Full K if small; else the largest multiple-of-128 divisor of K <= max_k_tile
    (exact division keeps the accumulation free of padded-garbage contributions)."""
    if K <= max_k_tile:
        return K
    cap = max(128, (max_k_tile // 128) * 128)
    for cand in range(cap, 127, -128):
        if K % cand == 0:
            return cand
    return K  # no clean split: keep full K resident


def _choose_patch_tile(n_patches, align, max_tile):
    """Full extent if it fits; else the largest multiple of `align` <= max_tile that
    divides n_patches (avoids ragged, masked last tiles); ragged fallback otherwise."""
    if n_patches <= max_tile:
        return n_patches
    cap = max(align, (max_tile // align) * align)
    for cand in range(cap, align - 1, -align):
        if n_patches % cand == 0:
            return cand
    return cap


# --------------------------------------------------------------------------------
# Wrapper
# --------------------------------------------------------------------------------
@functools.partial(
    jax.jit,
    static_argnames=("patch_size", "compute_dtype", "out_dtype",
                     "max_k_tile", "max_patch_tile"),
)
def embeddings_forward(x, conv_w, conv_b, pos_emb, patch_size,
                       compute_dtype=None, out_dtype=None,
                       max_k_tile=2048, max_patch_tile=512):
    """Pallas implementation of Embeddings.forward (eval mode).

    x:       (B, C_in, H, W)        NCHW, like PyTorch
    conv_w:  (C_out, C_in, ph, pw)  PyTorch Conv2d weight layout
    conv_b:  (C_out,)
    pos_emb: (1, n_patches, C_out)
    compute_dtype: dtype for X/W (e.g. jnp.bfloat16); accumulation stays f32.
    out_dtype:     dtype of the result (default: x.dtype).
    returns: (B, n_patches, C_out)
    """
    if x is None:
        return None

    ph, pw = patch_size
    B, C, H, W = x.shape
    C_out = conv_w.shape[0]
    Hp, Wp = H // ph, W // pw
    n_patches = Hp * Wp
    K = C * ph * pw

    cdtype = jnp.dtype(compute_dtype) if compute_dtype is not None else jnp.dtype(x.dtype)
    odtype = jnp.dtype(out_dtype) if out_dtype is not None else jnp.dtype(x.dtype)
    isz_c = cdtype.itemsize
    isz_o = odtype.itemsize

    # Match Conv2d VALID behaviour for non-divisible spatial dims: drop the remainder.
    if H != Hp * ph or W != Wp * pw:
        x = x[:, :, :Hp * ph, :Wp * pw]

    # ---- glue: cast FIRST (halves the transpose's extra HBM copy for bf16), then
    #            rearrange image into per-batch patch matrices (B, n_patches, K).
    xc = x.astype(cdtype)
    xp = xc.reshape(B, C, Hp, ph, Wp, pw).transpose(0, 2, 4, 1, 3, 5)
    xp = xp.reshape(B, n_patches, K)

    # ---- glue: flatten conv weight to (K, C_out); fold bias into pos table (f32).
    w = conv_w.astype(cdtype).reshape(C_out, K).T                   # (K, C_out)
    pos_b = (pos_emb.reshape(n_patches, C_out).astype(jnp.float32)
             + conv_b.reshape(1, C_out).astype(jnp.float32))        # (n_patches, C_out)

    # ---- pad the output-channel (lane) dim to a multiple of 128: lane-dense stores,
    #      full MXU columns.  The pad is sliced off after the kernel.
    N = C_out
    N_pad = ((N + 127) // 128) * 128 if (N % 128) else N
    if N_pad != N:
        w = jnp.pad(w, ((0, 0), (0, N_pad - N)))
        pos_b = jnp.pad(pos_b, ((0, 0), (0, N_pad - N)))

    # ---- tiling: K tile (split-K only when needed), then patch tile from VMEM budget.
    TK = _choose_k_tile(K, max_k_tile)
    nk = K // TK
    split_k = nk > 1

    align = {4: 8, 2: 16, 1: 32}.get(isz_c, 8)      # sublane packing per dtype
    budget = 20 << 20                                # conservative working-set target
    fixed = 2 * TK * N_pad * isz_c                   # W (double-buffered)
    per_row = (2 * TK * isz_c                        # X (double-buffered)
               + N_pad * 2 * 4                       # pos+bias (f32, double-buffered)
               + N_pad * 2 * isz_o)                  # output (double-buffered)
    if split_k:
        per_row += N_pad * 4                         # f32 accumulator scratch
    tp_budget = max(align, (budget - fixed) // per_row)
    max_tp = max(align, (min(max_patch_tile, tp_budget) // align) * align)
    TP = _choose_patch_tile(n_patches, align, max_tp)

    work_bytes = fixed + TP * per_row
    vmem_limit = int(min(max(work_bytes * 3 // 2 + (4 << 20), 32 << 20), 48 << 20))

    np_tiles = pl.cdiv(n_patches, TP)

    # ---- grid: (patch_tiles, batch[, k_tiles]).  Batch inner of the patch axis so the
    #      pos_b block index is unchanged across consecutive steps (fetched once per
    #      patch tile, not once per batch element).  k (reduction) is innermost.
    if not split_k:
        grid = (np_tiles, B)
        in_specs = [
            pl.BlockSpec((1, TP, K), lambda p, b: (b, p, 0)),       # X: stream
            pl.BlockSpec((K, N_pad), lambda p, b: (0, 0)),          # W: grid-invariant
            pl.BlockSpec((TP, N_pad), lambda p, b: (p, 0)),         # pos+bias: per p-tile
        ]
        out_specs = pl.BlockSpec((1, TP, N_pad), lambda p, b: (b, p, 0))
        scratch_shapes = []
        kernel = _embed_kernel
        dims = ("parallel", "parallel")
    else:
        grid = (np_tiles, B, nk)
        in_specs = [
            pl.BlockSpec((1, TP, TK), lambda p, b, k: (b, p, k)),
            pl.BlockSpec((TK, N_pad), lambda p, b, k: (k, 0)),
            pl.BlockSpec((TP, N_pad), lambda p, b, k: (p, 0)),
        ]
        out_specs = pl.BlockSpec((1, TP, N_pad), lambda p, b, k: (b, p, 0))
        scratch_shapes = [pltpu.VMEM((TP, N_pad), jnp.float32)]
        kernel = _embed_kernel_splitk
        dims = ("parallel", "parallel", "arbitrary")

    # Advisory cost estimate (W is re-read per (p, b) only on the split-K path).
    w_reads = (np_tiles * B) if split_k else 1
    cost = pl.CostEstimate(
        flops=2 * B * n_patches * K * N_pad,
        transcendentals=0,
        bytes_accessed=int(xp.size * isz_c
                           + w.size * isz_c * w_reads
                           + pos_b.size * 4
                           + B * n_patches * N_pad * isz_o),
    )

    out = pl.pallas_call(
        kernel,
        out_shape=jax.ShapeDtypeStruct((B, n_patches, N_pad), odtype),
        grid_spec=pltpu.PrefetchScalarGridSpec(
            num_scalar_prefetch=0,
            grid=grid,
            in_specs=in_specs,
            out_specs=out_specs,
            scratch_shapes=scratch_shapes,
        ),
        compiler_params=pltpu.CompilerParams(
            dimension_semantics=dims,
            vmem_limit_bytes=vmem_limit,
        ),
        cost_estimate=cost,
    )(xp, w, pos_b)

    if N_pad != N:
        out = out[..., :N]
    return out


# --------------------------------------------------------------------------------
# Pure-JAX reference (matches the PyTorch forward, eval mode)
# --------------------------------------------------------------------------------
def _reference(x, conv_w, conv_b, pos_emb, patch_size):
    y = lax.conv_general_dilated(
        x, conv_w, window_strides=patch_size, padding="VALID",
        dimension_numbers=("NCHW", "OIHW", "NCHW"),
        precision=lax.Precision.HIGHEST)
    y = y + conv_b.reshape(1, -1, 1, 1)
    B, C_out = y.shape[0], y.shape[1]
    y = y.reshape(B, C_out, -1).transpose(0, 2, 1)   # flatten(2).transpose(-1,-2)
    return y + pos_emb


# --------------------------------------------------------------------------------
# Self-test
# --------------------------------------------------------------------------------
if __name__ == "__main__":
    key = jax.random.PRNGKey(0)
    kx, kw, kb, kp = jax.random.split(key, 4)

    # ---- config 1: full-K path, small ViT-like shapes ---------------------------
    B, C_in, H, W = 2, 4, 16, 16
    patch = (4, 4)
    n_patches = (H // patch[0]) * (W // patch[1])
    C_out = C_in

    x = jax.random.normal(kx, (B, C_in, H, W), dtype=jnp.float32)
    conv_w = jax.random.normal(kw, (C_out, C_in, *patch), dtype=jnp.float32) * 0.1
    conv_b = jax.random.normal(kb, (C_out,), dtype=jnp.float32) * 0.1
    # PyTorch inits position_embeddings to zeros; use non-zero so the add is exercised.
    pos = jax.random.normal(kp, (1, n_patches, C_out), dtype=jnp.float32) * 0.02

    out = jax.block_until_ready(
        embeddings_forward(x, conv_w, conv_b, pos, patch_size=patch))
    ref = _reference(x, conv_w, conv_b, pos, patch)
    assert out.shape == (B, n_patches, C_out), out.shape
    assert jnp.allclose(out, ref, atol=1e-4, rtol=1e-4), "f32 full-K mismatch"

    # ---- config 1b: bf16 compute + bf16 output (expected precision loss) --------
    out_bf = jax.block_until_ready(
        embeddings_forward(x, conv_w, conv_b, pos, patch_size=patch,
                           compute_dtype=jnp.bfloat16, out_dtype=jnp.bfloat16))
    assert out_bf.dtype == jnp.bfloat16
    assert jnp.allclose(out_bf.astype(jnp.float32), ref, atol=5e-2, rtol=5e-2), \
        "bf16 mismatch"

    # ---- config 2: split-K path (patch 8x8 -> K=256, forced TK=128, 2 k-tiles) --
    patch2 = (8, 8)
    n_patches2 = (H // patch2[0]) * (W // patch2[1])
    conv_w2 = jax.random.normal(kw, (C_out, C_in, *patch2), dtype=jnp.float32) * 0.05
    pos2 = jax.random.normal(kp, (1, n_patches2, C_out), dtype=jnp.float32) * 0.02
    out2 = jax.block_until_ready(
        embeddings_forward(x, conv_w2, conv_b, pos2, patch_size=patch2,
                           max_k_tile=128))
    ref2 = _reference(x, conv_w2, conv_b, pos2, patch2)
    assert out2.shape == (B, n_patches2, C_out), out2.shape
    assert jnp.allclose(out2, ref2, atol=1e-4, rtol=1e-4), "f32 split-K mismatch"

    print("KERNEL_OK")
</pallas_src>

<mosaic_0001>
module attributes {stable_mosaic.version = 11 : i64} {
  func.func @_embed_kernel(%arg0: i32, %arg1: i32, %arg2: memref<1x16x64xf32, #tpu.memory_space<vmem>>, %arg3: memref<64x128xf32, #tpu.memory_space<vmem>>, %arg4: memref<16x128xf32, #tpu.memory_space<vmem>>, %arg5: memref<1x16x128xf32, #tpu.memory_space<vmem>>) attributes {dimension_semantics = [#tpu.dimension_semantics<parallel>, #tpu.dimension_semantics<parallel>], iteration_bounds = array<i64: 1, 2>, scalar_prefetch = 0 : i64, scratch_operands = 0 : i64, tpu.core_type = #tpu.core_type<tc>, window_params = [{transform_indices = @transform_0, window_bounds = array<i64: 1, 16, 64>}, {pipeline_mode = #tpu.pipeline_mode<synchronous>, transform_indices = @transform_1, window_bounds = array<i64: 64, 128>}, {transform_indices = @transform_2, window_bounds = array<i64: 16, 128>}, {transform_indices = @transform_3, window_bounds = array<i64: 1, 16, 128>}]} {
    %c0 = arith.constant 0 : index
    %c0_0 = arith.constant 0 : index
    %c0_1 = arith.constant 0 : index
    %0 = vector.load %arg2[%c0, %c0_0, %c0_1] : memref<1x16x64xf32, #tpu.memory_space<vmem>>, vector<1x16x64xf32>
    %1 = vector.shape_cast %0 : vector<1x16x64xf32> to vector<16x64xf32>
    %c0_2 = arith.constant 0 : index
    %c0_3 = arith.constant 0 : index
    %2 = vector.load %arg3[%c0_2, %c0_3] : memref<64x128xf32, #tpu.memory_space<vmem>>, vector<64x128xf32>
    %cst = arith.constant dense<0.000000e+00> : vector<16x128xf32>
    %3 = tpu.matmul %1, %2, %cst {dimension_numbers = #tpu.dot_dimension_numbers<[1], [0], [0], [1], [0, 0, 1, 1], [], []>} : vector<16x64xf32>, vector<64x128xf32>, vector<16x128xf32> -> vector<16x128xf32>
    %c0_4 = arith.constant 0 : index
    %c0_5 = arith.constant 0 : index
    %4 = vector.load %arg4[%c0_4, %c0_5] : memref<16x128xf32, #tpu.memory_space<vmem>>, vector<16x128xf32>
    %5 = arith.addf %3, %4 : vector<16x128xf32>
    %c0_6 = arith.constant 0 : index
    %c0_7 = arith.constant 0 : index
    %c0_8 = arith.constant 0 : index
    %6 = vector.load %arg5[%c0_6, %c0_7, %c0_8] : memref<1x16x128xf32, #tpu.memory_space<vmem>>, vector<1x16x128xf32>
    %7 = vector.shape_cast %6 : vector<1x16x128xf32> to vector<16x128xf32>
    %8 = vector.shape_cast %5 : vector<16x128xf32> to vector<1x16x128xf32>
    tpu.vector_store %arg5[%c0_6, %c0_7, %c0_8], %8 {strides = array<i32>} : memref<1x16x128xf32, #tpu.memory_space<vmem>>, vector<1x16x128xf32>,
    return
  }
  func.func @transform_0(%arg0: i32, %arg1: i32) -> (i32, i32, i32) {
    %c0_i32 = arith.constant 0 : i32
    %c0_i32_0 = arith.constant 0 : i32
    return %arg1, %arg0, %c0_i32 : i32, i32, i32
  }
  func.func @transform_1(%arg0: i32, %arg1: i32) -> (i32, i32) {
    %c0_i32 = arith.constant 0 : i32
    %c0_i32_0 = arith.constant 0 : i32
    %c0_i32_1 = arith.constant 0 : i32
    return %c0_i32, %c0_i32_0 : i32, i32
  }
  func.func @transform_2(%arg0: i32, %arg1: i32) -> (i32, i32) {
    %c0_i32 = arith.constant 0 : i32
    %c0_i32_0 = arith.constant 0 : i32
    return %arg0, %c0_i32 : i32, i32
  }
  func.func @transform_3(%arg0: i32, %arg1: i32) -> (i32, i32, i32) {
    %c0_i32 = arith.constant 0 : i32
    %c0_i32_0 = arith.constant 0 : i32
    return %arg1, %arg0, %c0_i32 : i32, i32, i32
  }
}

</mosaic_0001>

<bundles_post_ra>
// kernel: embeddings_forward.1
= control target key start
LH: loop header
LB: loop body
LE: loop exit
PB: predicated region body
PF: predicated region fallthrough
CT: control target
= control target key end

     0   :  { %s470_s12 = smov 0   ;;  %s472_s13 = smov 0   ;;  %s533_s0 = inlined_call_operand.vmem [shape: f32[2,16,64], index: 0, kind: input, shape index: {}]   ;;  %s534_s1 = inlined_call_operand.vmem [shape: f32[64,128], index: 1, kind: input, shape index: {}]   ;;  %s535_s2 = inlined_call_operand.vmem [shape: f32[16,128], index: 2, kind: input, shape index: {}]   ;;  %s536_s3 = inlined_call_operand.vmem [shape: f32[2,16,128], index: 3, kind: output, shape index: {}]  }
   0x1   :  { %s474_s14 = smov 0  }
   0x2 LB: > { %s22_s15 = sadd.s32 1, %s444_s13  ;;  %p383_p0 = scmp.ge.s32.totalorder %s448_s14, 1  ;;  %s448_s14 = sphi %s474_s14, %s13_s14   ;;  %s444_s13 = sphi %s472_s13, %s538_s13   ;;  %s440_s12 = sphi %s470_s12, %s537_s12  }
   0x3   : > { %p23_p1 = scmp.ge.s32.totalorder %s22_s15, 2  ;;  %p169_p2 = scmp.lt.s32.totalorder %s448_s14, 3 }
   0x5   : > { %s540_s15 = smov (%p23_p1, %s22_s15), 0  ;;  %p170_p3 = pnand %p383_p0, %p169_p2 }
   0x6   : > { %p207_p4 = scmp.lt.s32.totalorder (!%p170_p3), %s440_s12, 1 }
   0x7   : > { %173 = sbr.rel (%p170_p3) target bundleno = 158 (0x9e), region = 32 }
   0xc   : > { %v241_v0 = vld [vmem:[%s534_s1 + $0x38] sm:$0xff]  ;;  %v240_v1 = vld [vmem:[%s534_s1 + $0x30] sm:$0xff]  ;;  %v239_v2 = vld [vmem:[%s534_s1 + $0x28] sm:$0xff]  ;;  %s542_s12 = smov (!%p207_p4, %s440_s12), 1  ;;  %vm244_vm0 = vcmask 523264  }
   0xd   : > { %259 = vmatpush.msra.mxu0 %v241_v0  ;;  %394 = vmatpush.msra.mxu1 %v241_v0  ;;  %v238_v3 = vld [vmem:[%s534_s1 + $0x20] sm:$0xff]  ;;  %v237_v4 = vld [vmem:[%s534_s1 + $0x18] sm:$0xff]  ;;  %s392_s26 = sshll.u32 %s542_s12, 4  ;;  %v236_v5 = vld [vmem:[%s534_s1 + $0x10] sm:$0xff] }
   0xe   : > { %v235_v6 = vld [vmem:[%s534_s1 + $0x8] sm:$0xff]  ;;  %s214_s6 = scalar_lea.vmem %s533_s0, %s392_s26  ;;  %v234_v7 = vld [vmem:[%s534_s1] sm:$0xff]  ;;  %s230_s18 = scalar_lea.vmem %s536_s3, %s392_s26 }
   0xf   : > { %260 = vmatpush.msra.mxu0 %v240_v1  ;;  %395 = vmatpush.msra.mxu1 %v240_v1  ;;  %v232_v8 = vld [vmem:[%s214_s6] sm:$0xff]  ;;  %v233_v9 = vld [vmem:[%s214_s6 + $0x8] sm:$0xff] }
  0x10   : > { %v242_v10 = vld [vmem:[%s535_s2] sm:$0xff]  ;;  %v243_v11 = vld [vmem:[%s535_s2 + $0x8] sm:$0xff] }
  0x11   : > { %261 = vmatpush.msra.mxu0 %v239_v2  ;;  %396 = vmatpush.msra.mxu1 %v239_v2 }
  0x13   : > { %262 = vmatpush.msra.mxu0 %v238_v3  ;;  %397 = vmatpush.msra.mxu1 %v238_v3 }
  0x15   : > { %263 = vmatpush.msra.mxu0 %v237_v4  ;;  %398 = vmatpush.msra.mxu1 %v237_v4 }
  0x17   : > { %264 = vmatpush.msra.mxu0 %v236_v5  ;;  %399 = vmatpush.msra.mxu1 %v236_v5 }
  0x19   : > { %265 = vmatpush.msra.mxu0 %v235_v6  ;;  %400 = vmatpush.msra.mxu1 %v235_v6 }
  0x1b   : > { %266 = vmatpush.msra.mxu0 %v234_v7  ;;  %401 = vmatpush.msra.mxu1 %v234_v7 }
  0x1c   : > { %388 = vmatmul.msk.f32.vlgmr.msra.gmra.mxu0 %vm244_vm0, %v232_v8  ;;  %389 = vmatmul.msk.f32.vlgmr.msra.gmra.mxu1 %vm244_vm0, %v233_v9 }
  0x99   : > { %v268_v12 = vpop.f32.mrf.mxu0  ;;  %v271_v13 = vpop.f32.mrf.mxu1 }
  0x9a   : > { %v269_v14 = vadd.f32 %v268_v12, %v242_v10  ;;  %v272_v15 = vadd.f32 %v271_v13, %v243_v11 }
  0x9c   : > { %274 = vst [vmem:[%s230_s18] sm:$0xff] %v269_v14 }
  0x9d   : > { %275 = vst [vmem:[%s230_s18 + $0x8] sm:$0xff] %v272_v15 }
  0x9e PF: > { %s13_s14 = sadd.s32 1, %s448_s14   ;;  %s537_s12 = smov %s444_s13 }
  0x9f   : > { %p10_p5 = scmp.ge.s32.totalorder %s13_s14, 4   ;;  %s538_s13 = smov %s540_s15 }
  0xa1   :  { %12 = sbr.rel (!%p10_p5) target bundleno = 2 (0x2), region = 65 }

</bundles_post_ra>
